<compile_context>
chip_gen: v7x
topology: tpu7x:2x2x1
jax: 0.10.0
libtpu: 0.0.40
codegen_flags: <defaults>
</compile_context>

<pallas_src>
import functools

import jax
import jax.numpy as jnp
from jax.experimental import pallas as pl
from jax.experimental.pallas import tpu as pltpu

_VMEM_LIMIT = 64 * 1024 * 1024  # explicit scoped-VMEM budget for every call


# --------------------------- tiling / padding helpers -------------------------

def _tile_for(dim, target, align):
    """Pick a tile <= target for `dim`.

    Returns (tile, padded_dim). Prefers an aligned exact divisor; otherwise
    pads the axis up to a multiple of an aligned tile (never returns a
    full-axis block for large dims, so VMEM stays bounded).
    """
    if dim <= target:
        return dim, dim            # full-dim block: always legal, no padding
    t = (target // align) * align
    while t >= align:
        if dim % t == 0:
            return t, dim
        t -= align
    t = max((target // align) * align, align)
    return t, pl.cdiv(dim, t) * t


def _pad2d(a, rows, cols):
    r, c = a.shape
    if r == rows and c == cols:
        return a
    return jnp.pad(a, ((0, rows - r), (0, cols - c)))


# --------------------------- tiled linear (+bias, +ReLU) ----------------------

def _matmul_kernel(x_ref, w_ref, b_ref, o_ref, acc_ref, *, relu):
    k = pl.program_id(2)

    @pl.when(k == 0)
    def _():
        acc_ref[...] = jnp.zeros_like(acc_ref)

    acc_ref[...] += jnp.dot(
        x_ref[...].astype(jnp.bfloat16),
        w_ref[...].astype(jnp.bfloat16),
        preferred_element_type=jnp.float32,
    )

    @pl.when(k == pl.num_programs(2) - 1)
    def _():
        y = acc_ref[...] + b_ref[...].astype(jnp.float32)
        if relu:
            y = jnp.maximum(y, 0.0)
        o_ref[...] = y.astype(o_ref.dtype)


def linear_pallas(x2d, w, b, relu=False, out_dtype=jnp.bfloat16,
                  *, tm=512, tn=512, tk=512):
    """y = x2d @ w + b (optionally ReLU). bf16 matmul, f32 accumulate."""
    M, K = x2d.shape
    N = w.shape[1]
    tm, Mp = _tile_for(M, tm, 16)    # 16-sublane alignment for bf16 tiles
    tn, Np = _tile_for(N, tn, 128)
    tk, Kp = _tile_for(K, tk, 128)
    xp = _pad2d(x2d, Mp, Kp)
    wp = _pad2d(w, Kp, Np)
    bp = b if Np == N else jnp.pad(b, (0, Np - N))
    grid = (Mp // tm, Np // tn, Kp // tk)
    kernel = functools.partial(_matmul_kernel, relu=relu)
    out = pl.pallas_call(
        kernel,
        grid=grid,
        in_specs=[
            pl.BlockSpec((tm, tk), lambda i, j, k: (i, k)),
            pl.BlockSpec((tk, tn), lambda i, j, k: (k, j)),
            pl.BlockSpec((1, tn), lambda i, j, k: (0, j)),
        ],
        out_specs=pl.BlockSpec((tm, tn), lambda i, j, k: (i, j)),
        out_shape=jax.ShapeDtypeStruct((Mp, Np), out_dtype),
        scratch_shapes=[pltpu.VMEM((tm, tn), jnp.float32)],
        compiler_params=pltpu.CompilerParams(
            dimension_semantics=("parallel", "parallel", "arbitrary"),
            vmem_limit_bytes=_VMEM_LIMIT),
    )(xp, wp, bp.reshape(1, Np))
    if Mp != M or Np != N:
        out = out[:M, :N]
    return out


# --------------- fused matmul + bias + residual-add + LayerNorm ---------------
# Requires the output tile to cover the full row (tn == N == d_model), which
# holds for d_model up to ~2K.  Saves a full (M, D) HBM round-trip + a launch.

def _matmul_add_ln_kernel(x_ref, w_ref, b_ref, r_ref, g_ref, beta_ref,
                          o_ref, acc_ref):
    k = pl.program_id(1)

    @pl.when(k == 0)
    def _():
        acc_ref[...] = jnp.zeros_like(acc_ref)

    acc_ref[...] += jnp.dot(
        x_ref[...].astype(jnp.bfloat16),
        w_ref[...].astype(jnp.bfloat16),
        preferred_element_type=jnp.float32,
    )

    @pl.when(k == pl.num_programs(1) - 1)
    def _():
        y = (acc_ref[...] + b_ref[...].astype(jnp.float32)
             + r_ref[...].astype(jnp.float32))            # matmul + bias + residual
        mean = jnp.mean(y, axis=-1, keepdims=True)
        var = jnp.mean(jnp.square(y - mean), axis=-1, keepdims=True)
        yn = (y - mean) * jax.lax.rsqrt(var + 1e-5)       # PyTorch LayerNorm eps
        o_ref[...] = (yn * g_ref[...].astype(jnp.float32)
                      + beta_ref[...].astype(jnp.float32)).astype(o_ref.dtype)


def linear_add_ln_pallas(x2d, w, b, res2d, gamma, beta, *, tm=256, tk=512):
    """LayerNorm( x2d @ w + b + res2d ) in one pallas_call (full-row N tile)."""
    M, K = x2d.shape
    N = w.shape[1]
    tm, Mp = _tile_for(M, tm, 16)
    tk, Kp = _tile_for(K, tk, 128)
    xp = _pad2d(x2d, Mp, Kp)
    wp = _pad2d(w, Kp, N)
    rp = _pad2d(res2d, Mp, N)
    grid = (Mp // tm, Kp // tk)
    out = pl.pallas_call(
        _matmul_add_ln_kernel,
        grid=grid,
        in_specs=[
            pl.BlockSpec((tm, tk), lambda i, k: (i, k)),
            pl.BlockSpec((tk, N), lambda i, k: (k, 0)),
            pl.BlockSpec((1, N), lambda i, k: (0, 0)),
            pl.BlockSpec((tm, N), lambda i, k: (i, 0)),   # residual: fetched once per i
            pl.BlockSpec((1, N), lambda i, k: (0, 0)),
            pl.BlockSpec((1, N), lambda i, k: (0, 0)),
        ],
        out_specs=pl.BlockSpec((tm, N), lambda i, k: (i, 0)),
        out_shape=jax.ShapeDtypeStruct((Mp, N), jnp.bfloat16),
        scratch_shapes=[pltpu.VMEM((tm, N), jnp.float32)],
        compiler_params=pltpu.CompilerParams(
            dimension_semantics=("parallel", "arbitrary"),
            vmem_limit_bytes=_VMEM_LIMIT),
    )(xp, wp, b.reshape(1, N), rp, gamma.reshape(1, N), beta.reshape(1, N))
    return out[:M] if Mp != M else out


# --------------------------- attention (all heads per batch step) -------------

def _attention_kernel(qkv_ref, bias_ref, o_ref, *, n_head):
    L = qkv_ref.shape[1]
    D = qkv_ref.shape[2] // 3
    Dh = D // n_head
    scale = 1.0 / float(Dh) ** 0.5
    for h in range(n_head):  # static loop; heads are static column slices
        q = qkv_ref[0, :, h * Dh:(h + 1) * Dh].astype(jnp.bfloat16)          # (L, Dh)
        k = qkv_ref[0, :, D + h * Dh:D + (h + 1) * Dh].astype(jnp.bfloat16)  # (L, Dh)
        v = qkv_ref[0, :, 2 * D + h * Dh:2 * D + (h + 1) * Dh].astype(jnp.bfloat16)
        s = jnp.dot(q, k.T, preferred_element_type=jnp.float32) * scale
        s = s + bias_ref[h].astype(jnp.float32)                               # (L, L)
        s = s - jnp.max(s, axis=-1, keepdims=True)
        p = jnp.exp(s)                                                        # f32 stats
        row_sum = jnp.sum(p, axis=-1, keepdims=True)                          # (L, 1)
        o_h = jnp.dot(p.astype(jnp.bfloat16), v,
                      preferred_element_type=jnp.float32)                     # (L, Dh)
        # normalize AFTER the PV matmul: (L, Dh) multiply instead of (L, L)
        o_h = o_h * pl.reciprocal(row_sum, approx=True)
        # per-head static-slice store into the lane-dense (L, D) output block
        o_ref[0, :, h * Dh:(h + 1) * Dh] = o_h.astype(o_ref.dtype)


def attention_pallas(qkv, bias, n_head):
    """qkv: (B, L, 3D) bf16 fused projections; bias: (H, L, L) bf16 rel-pos bias."""
    B, L, D3 = qkv.shape
    D = D3 // 3
    H = bias.shape[0]
    kernel = functools.partial(_attention_kernel, n_head=n_head)
    return pl.pallas_call(
        kernel,
        grid=(B,),
        in_specs=[
            pl.BlockSpec((1, L, D3), lambda b: (b, 0, 0)),
            pl.BlockSpec((H, L, L), lambda b: (0, 0, 0)),  # grid-constant: fetched once
        ],
        out_specs=pl.BlockSpec((1, L, D), lambda b: (b, 0, 0)),
        out_shape=jax.ShapeDtypeStruct((B, L, D), jnp.bfloat16),
        compiler_params=pltpu.CompilerParams(
            dimension_semantics=("parallel",),
            vmem_limit_bytes=_VMEM_LIMIT),
    )(qkv, bias)


# --------------------------- model (glue in plain JAX) ------------------------

def encoder_layer(x, p, n_head):
    """Post-LN transformer encoder layer with relative attention bias."""
    B, L, D = x.shape
    x2d = x.reshape(B * L, D)

    # fused Q|K|V projection: one matmul, (B*L, 3D) bf16
    qkv = linear_pallas(x2d, p['wqkv'], p['bqkv']).reshape(B, L, 3 * D)

    # relative-position bias (H, L, L) bf16: bias[h, i, j] = table[h, i - j + L - 1]
    rel_idx = jnp.arange(L)[:, None] - jnp.arange(L)[None, :] + (L - 1)
    bias = p['rel_table'][:, rel_idx].astype(jnp.bfloat16)             # (H, L, L)

    attn = attention_pallas(qkv, bias, n_head)                          # (B, L, D) bf16

    # h1 = LayerNorm(attn @ wo + bo + x)   — fused into the wo matmul finalize
    h1 = linear_add_ln_pallas(attn.reshape(B * L, D), p['wo'], p['bo'],
                              x2d, p['ln1_g'], p['ln1_b'])
    # feed-forward; second matmul fuses residual + LayerNorm as well
    ff1 = linear_pallas(h1, p['w1'], p['b1'], relu=True)
    h2 = linear_add_ln_pallas(ff1, p['w2'], p['b2'], h1, p['ln2_g'], p['ln2_b'])
    return h2.reshape(B, L, D)


def teacher_relative_forward(x, params, n_head):
    """x: (batch, num_events, num_channels, input_dim)
       returns list of per-channel logits (batch, num_events, num_tokens_of_channel)."""
    B, E, C, In = x.shape

    # linear_to_input_transformer (bf16 activation edge)
    d_trunc = params['w_in'].shape[1]                   # d_model - positional_embedding_size
    h = linear_pallas(x.reshape(B * E * C, In).astype(jnp.bfloat16),
                      params['w_in'], params['b_in'])
    h = h.reshape(B, E * C, d_trunc)                    # flatten(x)

    # channel_embeddings.repeat(B, E, 1) -> (B, E*C, pe_size)
    ch = jnp.tile(params['channel_embeddings'].astype(jnp.bfloat16), (B, E, 1))
    seq = jnp.concatenate([h, ch], axis=2)              # (B, L=E*C, d_model) bf16

    for p in params['layers']:
        seq = encoder_layer(seq, p, n_head)

    D = seq.shape[-1]
    # All per-channel heads in ONE concatenated (D, sum(N)) matmul; f32 logits.
    y = linear_pallas(seq.reshape(B * E * C, D), params['w_heads'],
                      params['b_heads'], out_dtype=jnp.float32)
    y = y.reshape(B, E, C, -1)

    logits = []
    off = 0
    for c, n in enumerate(params['tokens_per_channel']):
        logits.append(y[:, :, c, off:off + n])
        off += n
    return logits


# --------------------------- deterministic parameter init ---------------------

def init_params(key, *, input_dim, pe_size, d_model, n_head, dim_ff, num_layers,
                num_channels, num_tokens, num_tokens_per_channel):
    keys = iter(jax.random.split(key, 512))

    def nrm(shape, scale=0.1):
        return scale * jax.random.normal(next(keys), shape, dtype=jnp.float32)

    def w_bf16(shape, scale=0.1):
        # matmul weights stored bf16 (MXU-friendly, halves HBM weight bytes)
        return nrm(shape, scale).astype(jnp.bfloat16)

    L = num_tokens
    params = {
        'channel_embeddings': nrm((1, num_channels, pe_size), 1.0),
        'w_in': w_bf16((input_dim, d_model - pe_size)),
        'b_in': nrm((d_model - pe_size,)),
        'layers': [],
        'tokens_per_channel': list(num_tokens_per_channel),
    }
    for _ in range(num_layers):
        params['layers'].append({
            'wqkv': w_bf16((d_model, 3 * d_model)), 'bqkv': nrm((3 * d_model,)),
            'wo': w_bf16((d_model, d_model)), 'bo': nrm((d_model,)),
            'rel_table': nrm((n_head, 2 * L - 1)),
            'ln1_g': jnp.ones((d_model,), jnp.float32),
            'ln1_b': jnp.zeros((d_model,), jnp.float32),
            'w1': w_bf16((d_model, dim_ff)), 'b1': nrm((dim_ff,)),
            'w2': w_bf16((dim_ff, d_model)), 'b2': nrm((d_model,)),
            'ln2_g': jnp.ones((d_model,), jnp.float32),
            'ln2_b': jnp.zeros((d_model,), jnp.float32),
        })
    # concatenated pre-softmax heads: (D, sum(N)) / (sum(N),)
    head_ws = [nrm((d_model, n)) for n in num_tokens_per_channel]
    head_bs = [nrm((n,)) for n in num_tokens_per_channel]
    params['w_heads'] = jnp.concatenate(head_ws, axis=1).astype(jnp.bfloat16)
    params['b_heads'] = jnp.concatenate(head_bs, axis=0)
    return params


# --------------------------- main ---------------------------------------------

if __name__ == "__main__":
    # small shapes consistent with the module
    B, E, C = 2, 8, 4                 # batch, num_events, num_channels
    input_dim = 16                    # data_processor.embedding_size
    pe_size = 8                       # positional_embedding_size
    d_model = 32
    n_head = 4
    dim_ff = 64
    num_layers = 2
    num_tokens_per_channel = [10, 12, 14, 16]
    num_tokens = E * C                # sequence length (num_tokens % num_channels == 0)

    key = jax.random.PRNGKey(0)
    kx, kp = jax.random.split(key)
    x = jax.random.normal(kx, (B, E, C, input_dim), dtype=jnp.float32)

    params = init_params(kp, input_dim=input_dim, pe_size=pe_size, d_model=d_model,
                         n_head=n_head, dim_ff=dim_ff, num_layers=num_layers,
                         num_channels=C, num_tokens=num_tokens,
                         num_tokens_per_channel=num_tokens_per_channel)

    logits = teacher_relative_forward(x, params, n_head)
    logits = jax.block_until_ready(logits)

    for c, lg in enumerate(logits):
        assert lg.shape == (B, E, num_tokens_per_channel[c]), lg.shape
        assert lg.dtype == jnp.float32
        assert bool(jnp.all(jnp.isfinite(lg)))

    print("KERNEL_OK")
</pallas_src>

<mosaic_0001>
module attributes {stable_mosaic.version = 11 : i64} {
  func.func @_matmul_kernel(%arg0: i32, %arg1: i32, %arg2: i32, %arg3: memref<64x16xbf16, #tpu.memory_space<vmem>>, %arg4: memref<16x24xbf16, #tpu.memory_space<vmem>>, %arg5: memref<1x24xf32, #tpu.memory_space<vmem>>, %arg6: memref<64x24xbf16, #tpu.memory_space<vmem>>, %arg7: memref<64x24xf32, #tpu.memory_space<vmem>>) attributes {dimension_semantics = [#tpu.dimension_semantics<parallel>, #tpu.dimension_semantics<parallel>, #tpu.dimension_semantics<arbitrary>], iteration_bounds = array<i64: 1, 1, 1>, scalar_prefetch = 0 : i64, scratch_operands = 1 : i64, tpu.core_type = #tpu.core_type<tc>, window_params = [{transform_indices = @transform_0, window_bounds = array<i64: 64, 16>}, {transform_indices = @transform_1, window_bounds = array<i64: 16, 24>}, {transform_indices = @transform_2, window_bounds = array<i64: 1, 24>}, {transform_indices = @transform_3, window_bounds = array<i64: 64, 24>}]} {
    %c0_i32 = arith.constant 0 : i32
    %0 = arith.cmpi eq, %arg2, %c0_i32 : i32
    %1 = arith.extui %0 : i1 to i32
    %c0_i32_0 = arith.constant 0 : i32
    %2 = arith.cmpi ne, %1, %c0_i32_0 : i32
    scf.if %2 {
      %cst_10 = arith.constant 0.000000e+00 : f32
      %12 = vector.broadcast %cst_10 : f32 to vector<64x24xf32>
      %c0_11 = arith.constant 0 : index
      %c0_12 = arith.constant 0 : index
      %13 = vector.load %arg7[%c0_11, %c0_12] : memref<64x24xf32, #tpu.memory_space<vmem>>, vector<64x24xf32>
      tpu.vector_store %arg7[%c0_11, %c0_12], %12 {strides = array<i32>} : memref<64x24xf32, #tpu.memory_space<vmem>>, vector<64x24xf32>,
    } else {
    }
    %c0 = arith.constant 0 : index
    %c0_1 = arith.constant 0 : index
    %3 = vector.load %arg7[%c0, %c0_1] : memref<64x24xf32, #tpu.memory_space<vmem>>, vector<64x24xf32>
    %c0_2 = arith.constant 0 : index
    %c0_3 = arith.constant 0 : index
    %4 = vector.load %arg3[%c0_2, %c0_3] : memref<64x16xbf16, #tpu.memory_space<vmem>>, vector<64x16xbf16>
    %c0_4 = arith.constant 0 : index
    %c0_5 = arith.constant 0 : index
    %5 = vector.load %arg4[%c0_4, %c0_5] : memref<16x24xbf16, #tpu.memory_space<vmem>>, vector<16x24xbf16>
    %cst = arith.constant dense<0.000000e+00> : vector<64x24xf32>
    %6 = tpu.matmul %4, %5, %cst {dimension_numbers = #tpu.dot_dimension_numbers<[1], [0], [0], [1], [0, 0, 1, 1], [], []>} : vector<64x16xbf16>, vector<16x24xbf16>, vector<64x24xf32> -> vector<64x24xf32>
    %7 = arith.addf %3, %6 : vector<64x24xf32>
    %c0_6 = arith.constant 0 : index
    %c0_7 = arith.constant 0 : index
    %8 = vector.load %arg7[%c0_6, %c0_7] : memref<64x24xf32, #tpu.memory_space<vmem>>, vector<64x24xf32>
    tpu.vector_store %arg7[%c0_6, %c0_7], %7 {strides = array<i32>} : memref<64x24xf32, #tpu.memory_space<vmem>>, vector<64x24xf32>,
    %c0_i32_8 = arith.constant 0 : i32
    %9 = arith.cmpi eq, %arg2, %c0_i32_8 : i32
    %10 = arith.extui %9 : i1 to i32
    %c0_i32_9 = arith.constant 0 : i32
    %11 = arith.cmpi ne, %10, %c0_i32_9 : i32
    scf.if %11 {
      %c0_10 = arith.constant 0 : index
      %c0_11 = arith.constant 0 : index
      %12 = vector.load %arg7[%c0_10, %c0_11] : memref<64x24xf32, #tpu.memory_space<vmem>>, vector<64x24xf32>
      %c0_12 = arith.constant 0 : index
      %c0_13 = arith.constant 0 : index
      %13 = vector.load %arg5[%c0_12, %c0_13] : memref<1x24xf32, #tpu.memory_space<vmem>>, vector<1x24xf32>
      %14 = vector.broadcast %13 : vector<1x24xf32> to vector<64x24xf32>
      %15 = arith.addf %12, %14 : vector<64x24xf32>
      %16 = arith.truncf %15 : vector<64x24xf32> to vector<64x24xbf16>
      %c0_14 = arith.constant 0 : index
      %c0_15 = arith.constant 0 : index
      %17 = vector.load %arg6[%c0_14, %c0_15] : memref<64x24xbf16, #tpu.memory_space<vmem>>, vector<64x24xbf16>
      tpu.vector_store %arg6[%c0_14, %c0_15], %16 {strides = array<i32>} : memref<64x24xbf16, #tpu.memory_space<vmem>>, vector<64x24xbf16>,
    } else {
    }
    return
  }
  func.func @transform_0(%arg0: i32, %arg1: i32, %arg2: i32) -> (i32, i32) {
    %c0_i32 = arith.constant 0 : i32
    return %arg0, %arg2 : i32, i32
  }
  func.func @transform_1(%arg0: i32, %arg1: i32, %arg2: i32) -> (i32, i32) {
    %c0_i32 = arith.constant 0 : i32
    return %arg2, %arg1 : i32, i32
  }
  func.func @transform_2(%arg0: i32, %arg1: i32, %arg2: i32) -> (i32, i32) {
    %c0_i32 = arith.constant 0 : i32
    %c0_i32_0 = arith.constant 0 : i32
    return %c0_i32, %arg1 : i32, i32
  }
  func.func @transform_3(%arg0: i32, %arg1: i32, %arg2: i32) -> (i32, i32) {
    %c0_i32 = arith.constant 0 : i32
    return %arg0, %arg1 : i32, i32
  }
}

</mosaic_0001>

<bundles_post_ra>
// kernel: tpu_custom_call.1
= control target key start
LH: loop header
LB: loop body
LE: loop exit
PB: predicated region body
PF: predicated region fallthrough
CT: control target
= control target key end

     0   :  { %8 = vsyncpa [#allocation4], 0  ;;  %s556_s0 = inlined_call_operand.hbm [shape: bf16[64,16], index: 0, kind: input, shape index: {}]   ;;  %s557_s1 = inlined_call_operand.hbm [shape: bf16[16,24], index: 1, kind: input, shape index: {}]   ;;  %s558_s2 = inlined_call_operand.hbm [shape: f32[1,24], index: 2, kind: input, shape index: {}]   ;;  %s559_s3 = inlined_call_operand.hbm [shape: bf16[64,24], index: 3, kind: output, shape index: {}]  }
   0x1   :  { %9 = vsyncpa [#allocation7], 0 }
   0x2   :  { %10 = vsyncpa [#allocation5], 0  ;;  %s441_s12 = smov [#allocation6]   ;;  %s442_s14 = smov [#allocation3]  }
   0x3   :  { %s28_s13 = sshll.u32 %s441_s12, 4  ;;  %s16_s15 = sshll.u32 %s442_s14, 4  ;;  %s29_s13 = int_to_ptr.vmem [resolvable:$true] %s28_s13  ;;  %s468_s15 = int_to_ptr.vmem [resolvable:$true] %s16_s15 }
   0x4   :  { %s347_s18 = scalar_lea.hbm %s557_s1, 128 }
   0x5   :  { %p348_p0 = scmp.ne.s32.totalorder %s557_s1, %s347_s18  ;;  %p351_p1 = scmp.lt.u32.totalorder %s347_s18, %s557_s1 }
   0x7   :  { %p353_p2 = pnand %p351_p1, %p348_p0 }
   0x9   :  { %356 = shalt.err (!%p353_p2)
}
   0xa   :  { %s357_s23 = scalar_lea.vmem %s29_s13, 128  ;;  %p362_p4 = scmp.lt.s32.totalorder %s29_s13, %s29_s13 }
   0xb   :  { %p358_p3 = scmp.ne.s32.totalorder %s29_s13, %s357_s23  ;;  %p363_p5 = scmp.lt.s32.totalorder %s357_s23, %s357_s23 }
   0xd   :  { %p364_p6 = por %p363_p5, %p362_p4 }
   0xf   :  { %p365_p7 = pnand %p364_p6, %p358_p3 }
  0x11   :  { %368 = shalt.err (!%p365_p7)
}
  0x12   :  { %s443_s24 = smov 64   ;;  %s444_s25 = smov 4  }
  0x13   :  { %34 = dma.hbm_to_vmem [thread:$0]  %s557_s1, 128, %s29_s13, [#allocation7], %s443_s24, %s443_s24, %s444_s25  }
  0x14   :  { %s369_s30 = scalar_lea.hbm %s556_s0, 512 }
  0x15   :  { %p370_p8 = scmp.ne.s32.totalorder %s556_s0, %s369_s30  ;;  %p373_p9 = scmp.lt.u32.totalorder %s369_s30, %s556_s0 }
  0x17   :  { %p375_p10 = pnand %p373_p9, %p370_p8 }
  0x19   :  { %378 = shalt.err (!%p375_p10)
}
  0x1a   :  { %s379_s8 = scalar_lea.vmem %s468_s15, 512  ;;  %p384_p12 = scmp.lt.s32.totalorder %s468_s15, %s468_s15 }
  0x1b   :  { %p380_p11 = scmp.ne.s32.totalorder %s468_s15, %s379_s8  ;;  %p385_p13 = scmp.lt.s32.totalorder %s379_s8, %s379_s8 }
  0x1d   :  { %p386_p0 = por %p385_p13, %p384_p12 }
  0x1f   :  { %p387_p1 = pnand %p386_p0, %p380_p11 }
  0x21   :  { %390 = shalt.err (!%p387_p1)
}
  0x22   :  { %22 = dma.hbm_to_vmem [thread:$0]  %s556_s0, 512, %s468_s15, [#allocation4], %s443_s24, %s443_s24, %s444_s25  }
  0x23   :  { %s445_s10 = smov [#allocation8]   ;;  %s391_s14 = scalar_lea.hbm %s558_s2, 16 }
  0x24   :  { %s41_s11 = sshll.u32 %s445_s10, 4  ;;  %p392_p2 = scmp.ne.s32.totalorder %s558_s2, %s391_s14  ;;  %s42_s11 = int_to_ptr.vmem [resolvable:$true] %s41_s11 }
  0x25   :  { %p395_p3 = scmp.lt.u32.totalorder %s391_s14, %s558_s2 }
  0x27   :  { %p397_p4 = pnand %p395_p3, %p392_p2 }
  0x29   :  { %400 = shalt.err (!%p397_p4)
}
  0x2a   :  { %s401_s20 = scalar_lea.vmem %s42_s11, 16  ;;  %s405_s0 = scalar_lea.vmem %s42_s11, 32 }
  0x2b   :  { %p402_p5 = scmp.ne.s32.totalorder %s42_s11, %s401_s20  ;;  %p406_p6 = scmp.lt.s32.totalorder %s42_s11, %s42_s11 }
  0x2c   :  { %p407_p7 = scmp.lt.s32.totalorder %s405_s0, %s401_s20 }
  0x2e   :  { %p408_p8 = por %p407_p7, %p406_p6 }
  0x30   :  { %p409_p9 = pnand %p408_p8, %p402_p5 }
  0x32   :  { %412 = shalt.err (!%p409_p9)
}
  0x33   :  { %44 = dma.hbm_to_vmem [thread:$0]  %s558_s2, 16, %s42_s11, [#allocation7]  }
  0x34   :  { %435 = dma.done.wait [#allocation4], 512  }
  0x35   :  { %436 = vsyncadd [#allocation4], 4294966784 }
  0x36   :  { %437 = dma.done.wait [#allocation7], 144  }
  0x37   :  { %438 = vsyncadd [#allocation7], 4294967152  ;;  %vm59_vm0 = vcmask 195584   ;;  %v446_v0 = vmov 0.0   ;;  %v342_v1 = vld [vmem:[#allocation6] sm:$0xff]   ;;  %vm112_vm1 = vcmask 130048  }
  0x38   :  { %62 = vst.msk [vmem:[#allocation2 + $0x10] sm:$0xff] %vm59_vm0, %v446_v0  ;;  %60 = vst.msk [vmem:[#allocation2] sm:$0xff] %vm59_vm0, %v446_v0  ;;  %v343_v2 = vld [vmem:[#allocation3] sm:$0xff]   ;;  %323 = vmatprep.subr.bf16.mxu0 %v342_v1  ;;  %333 = vmatprep.subr.bf16.mxu1 %v342_v1  ;;  %v344_v3 = vld [vmem:[#allocation3 + $0x10] sm:$0xff]   ;;  %vm265_vm2 = vcmask 191488   ;;  %s447_s2 = smov [#allocation9]  }
  0x39   :  { %61 = vst.msk [vmem:[#allocation2 + $0x8] sm:$0xff] %vm59_vm0, %v446_v0  ;;  %63 = vst.msk [vmem:[#allocation2 + $0x18] sm:$0xff] %vm59_vm0, %v446_v0  ;;  %324 = vmatpush3.bf16.msra.mxu0 %v342_v1  ;;  %334 = vmatpush3.bf16.msra.mxu1 %v342_v1  ;;  %v345_v4 = vld [vmem:[#allocation3 + $0x8] sm:$0xff]   ;;  %v346_v5 = vld [vmem:[#allocation3 + $0x18] sm:$0xff]   ;;  %s279_s22 = sshll.u32 %s447_s2, 4  ;;  %s280_s22 = int_to_ptr.vmem [resolvable:$true] %s279_s22 }
  0x3a   :  { %64 = vst.msk [vmem:[#allocation2 + $0x20] sm:$0xff] %vm59_vm0, %v446_v0  ;;  %65 = vst.msk [vmem:[#allocation2 + $0x28] sm:$0xff] %vm59_vm0, %v446_v0  ;;  %325 = vmatprep.mubr.msk.bf16.mxu0 %vm112_vm1, %v343_v2  ;;  %329 = vmatprep.mubr.msk.bf16.mxu1 %vm112_vm1, %v344_v3  ;;  %v301_v30 = vld [vmem:[#allocation8] ss:$0 sm:$0xff]  ;;  %s413_s23 = scalar_lea.vmem %s280_s22, 512  ;;  %p418_p11 = scmp.lt.s32.totalorder %s280_s22, %s280_s22 }
  0x3b   :  { %66 = vst.msk [vmem:[#allocation2 + $0x30] sm:$0xff] %vm59_vm0, %v446_v0  ;;  %67 = vst.msk [vmem:[#allocation2 + $0x38] sm:$0xff] %vm59_vm0, %v446_v0  ;;  %p414_p10 = scmp.ne.s32.totalorder %s280_s22, %s413_s23  ;;  %p419_p12 = scmp.lt.s32.totalorder %s413_s23, %s413_s23 }
  0x3c   :  { %326 = vmatmul.mubr.msk.bf16.vlgmr.msra.gmra.mrb[0].mxu0 %vm112_vm1, %v345_v4  ;;  %330 = vmatmul.mubr.msk.bf16.vlgmr.msra.gmra.mrb[0].mxu1 %vm112_vm1, %v346_v5 }
  0x3d   :  { %p420_p13 = por %p419_p12, %p418_p11 }
  0x3f   :  { %v70_v6 = vld [vmem:[#allocation2 + $0x10] sm:$0xff]  ;;  %v68_v8 = vld [vmem:[#allocation2] sm:$0xff]  ;;  %p421_p0 = pnand %p420_p13, %p414_p10 }
  0x40   :  { %v71_v12 = vld [vmem:[#allocation2 + $0x18] sm:$0xff]  ;;  %v69_v18 = vld [vmem:[#allocation2 + $0x8] sm:$0xff] }
  0x41   :  { %v72_v9 = vld [vmem:[#allocation2 + $0x20] sm:$0xff]  ;;  %v73_v19 = vld [vmem:[#allocation2 + $0x28] sm:$0xff] }
  0x42   :  { %v74_v7 = vld [vmem:[#allocation2 + $0x30] sm:$0xff]  ;;  %v75_v13 = vld [vmem:[#allocation2 + $0x38] sm:$0xff] }
 0x10f   :  { %v327_v10 = vpop.f32.mrb[0].mxu0  ;;  %v331_v11 = vpop.f32.mrb[0].mxu1 }
 0x110   :  { %v192_v14 = vadd.f32 %v327_v10, %v70_v6  ;;  %v196_v15 = vadd.f32 %v331_v11, %v74_v7  ;;  %v159_v16 = vpop.f32.mrb[1].mxu0  ;;  %v175_v17 = vpop.f32.mrb[1].mxu1 }
 0x111   :  { %v190_v20 = vadd.f32 %v159_v16, %v68_v8  ;;  %v194_v21 = vadd.f32 %v175_v17, %v72_v9  ;;  %v328_v22 = vpop.f32.mrb[2].mxu0  ;;  %v332_v23 = vpop.f32.mrb[2].mxu1 }
 0x112   :  { %201 = vst.msk [vmem:[#allocation2 + $0x10] sm:$0xff] %vm59_vm0, %v192_v14  ;;  %205 = vst.msk [vmem:[#allocation2 + $0x30] sm:$0xff] %vm59_vm0, %v196_v15  ;;  %v193_v24 = vadd.f32 %v328_v22, %v71_v12  ;;  %v197_v25 = vadd.f32 %v332_v23, %v75_v13  ;;  %v162_v26 = vpop.f32.mrb[3].mxu0  ;;  %v178_v27 = vpop.f32.mrb[3].mxu1 }
 0x113   :  { %199 = vst.msk [vmem:[#allocation2] sm:$0xff] %vm59_vm0, %v190_v20  ;;  %203 = vst.msk [vmem:[#allocation2 + $0x20] sm:$0xff] %vm59_vm0, %v194_v21  ;;  %v191_v28 = vadd.f32 %v162_v26, %v69_v18  ;;  %v195_v29 = vadd.f32 %v178_v27, %v73_v19 }
 0x114   :  { %202 = vst.msk [vmem:[#allocation2 + $0x18] sm:$0xff] %vm59_vm0, %v193_v24  ;;  %206 = vst.msk [vmem:[#allocation2 + $0x38] sm:$0xff] %vm59_vm0, %v197_v25 }
 0x115   :  { %200 = vst.msk [vmem:[#allocation2 + $0x8] sm:$0xff] %vm59_vm0, %v191_v28  ;;  %204 = vst.msk [vmem:[#allocation2 + $0x28] sm:$0xff] %vm59_vm0, %v195_v29 }
 0x119   :  { %v212_v31 = vld [vmem:[#allocation2 + $0x10] sm:$0xff] }
 0x11a   :  { %v216_v32 = vld [vmem:[#allocation2 + $0x30] sm:$0xff]  ;;  %v210_v33 = vld [vmem:[#allocation2] sm:$0xff]  ;;  %v227_v35 = vadd.f32 %v301_v30, %v212_v31 }
 0x11b   :  { %v214_v34 = vld [vmem:[#allocation2 + $0x20] sm:$0xff]  ;;  %v231_v36 = vadd.f32 %v301_v30, %v216_v32  ;;  %v213_v37 = vld [vmem:[#allocation2 + $0x18] sm:$0xff]  ;;  %v225_v39 = vadd.f32 %v301_v30, %v210_v33 }
 0x11c   :  { %v217_v38 = vld [vmem:[#allocation2 + $0x38] sm:$0xff]  ;;  %v229_v40 = vadd.f32 %v301_v30, %v214_v34  ;;  %v211_v41 = vld [vmem:[#allocation2 + $0x8] sm:$0xff]  ;;  %v228_v43 = vadd.f32 %v301_v30, %v213_v37  ;;  %v312_v45 = vpack.c.bf16 %v227_v35, %v227_v35 }
 0x11d   :  { %v215_v42 = vld [vmem:[#allocation2 + $0x28] sm:$0xff]  ;;  %v232_v44 = vadd.f32 %v301_v30, %v217_v38  ;;  %v316_v46 = vpack.c.bf16 %v231_v36, %v231_v36  ;;  %v226_v47 = vadd.f32 %v301_v30, %v211_v41  ;;  %v310_v49 = vpack.c.bf16 %v225_v39, %v225_v39 }
 0x11e   :  { %v230_v48 = vadd.f32 %v301_v30, %v215_v42  ;;  %v314_v50 = vpack.c.bf16 %v229_v40, %v229_v40  ;;  %v313_v51 = vpack.c.bf16 %v228_v43, %v228_v43  ;;  %268 = vst.msk [vmem:[#allocation9 + $0x8] sm:$0xf] %vm265_vm2, %v312_v45 }
 0x11f   :  { %v317_v52 = vpack.c.bf16 %v232_v44, %v232_v44  ;;  %272 = vst.msk [vmem:[#allocation9 + $0x18] sm:$0xf] %vm265_vm2, %v316_v46  ;;  %v311_v53 = vpack.c.bf16 %v226_v47, %v226_v47  ;;  %266 = vst.msk [vmem:[#allocation9] sm:$0xf] %vm265_vm2, %v310_v49 }
 0x120   :  { %v315_v54 = vpack.c.bf16 %v230_v48, %v230_v48  ;;  %270 = vst.msk [vmem:[#allocation9 + $0x10] sm:$0xf] %vm265_vm2, %v314_v50  ;;  %269 = vst.msk [vmem:[#allocation9 + $0xc] sm:$0xf] %vm265_vm2, %v313_v51 }
 0x121   :  { %273 = vst.msk [vmem:[#allocation9 + $0x1c] sm:$0xf] %vm265_vm2, %v317_v52  ;;  %267 = vst.msk [vmem:[#allocation9 + $0x4] sm:$0xf] %vm265_vm2, %v311_v53 }
 0x122   :  { %271 = vst.msk [vmem:[#allocation9 + $0x14] sm:$0xf] %vm265_vm2, %v315_v54 }
 0x123   :  { %424 = shalt.err (!%p421_p0)
}
 0x124   :  { %s425_s28 = scalar_lea.hbm %s559_s3, 512 }
 0x125   :  { %p426_p1 = scmp.ne.s32.totalorder %s559_s3, %s425_s28  ;;  %p429_p2 = scmp.lt.u32.totalorder %s425_s28, %s559_s3 }
 0x127   :  { %p431_p3 = pnand %p429_p2, %p426_p1 }
 0x129   :  { %434 = shalt.err (!%p431_p3)
}
 0x12a   :  { %285 = dma.vmem_to_hbm [thread:$0]  %s280_s22, 512, %s559_s3, [#allocation5], %s443_s24, %s443_s24, %s444_s25  }
 0x12b   :  { %439 = dma.done.wait [#allocation5], 512  }
 0x12c   :  { %440 = vsyncadd [#allocation5], 4294966784 }
 0x12d   :  { %289 = vsyncpa [#allocation4], 1 }
 0x12e   :  { %290 = vsyncpa [#allocation7], 1 }
 0x12f   :  { %291 = vsyncpa [#allocation5], 1 }

</bundles_post_ra>
